<compile_context>
chip_gen: v7x
topology: tpu7x:2x2x1
jax: 0.10.0
libtpu: 0.0.40
codegen_flags: <defaults>
</compile_context>

<pallas_src>
import functools
import math

import numpy as np
import jax
import jax.numpy as jnp
from jax import lax
from jax.experimental import pallas as pl
from jax.experimental.pallas import tpu as pltpu

NUM_ITERS = 50
GRADIENT_WEIGHT = 10.0
COLOR_WEIGHT = 10.0
# edge_exponent == 4.0 exactly -> realized as (g*g)*(g*g) (avoids pow lowering)
DIRECTIONS = ((-1, 0), (1, 0), (0, -1), (0, 1))
NEIGHBORHOOD = 10

ID_BITS = 8
ID_MASK = (1 << ID_BITS) - 1     # 255: packed-state path requires num_clusters <= 255

_SUBLANE = 8
_LANE = 128


def _round_up(n, m):
    return (n + m - 1) // m * m


@functools.cache
def _xlu_roll_available():
    """True iff pltpu.roll lowers on this backend and matches jnp.roll semantics
    for the (sublane, lane) static rotations used by the propagation kernel."""
    try:
        h, w = 16, 256
        x = np.arange(h * w, dtype=np.float32).reshape(h, w)

        def probe_kernel(x_ref, o_ref):
            a = x_ref[...]
            a = pltpu.roll(a, 1, axis=0)
            a = pltpu.roll(a, h - 1, axis=0)       # inverse -> identity
            a = pltpu.roll(a, 1, axis=1)
            a = pltpu.roll(a, w - 1, axis=1)       # inverse -> identity
            b = pltpu.roll(x_ref[...], 1, axis=0)  # direction check vs np.roll
            b = pltpu.roll(b, 1, axis=1)
            o_ref[...] = a + b

        out = pl.pallas_call(
            probe_kernel,
            out_shape=jax.ShapeDtypeStruct((h, w), jnp.float32),
        )(jnp.asarray(x))
        expect = x + np.roll(np.roll(x, 1, axis=0), 1, axis=1)
        return bool(np.allclose(np.asarray(out), expect))
    except Exception:
        return False


@functools.cache
def _batch_dim_semantics():
    """Prefer CORE_PARALLEL on the batch axis (splits the B-loop across the two
    TensorCores on v7x; ~2x for B >= 2).  Probe once; fall back to "parallel"
    if the backend rejects it or miscompiles the trivial probe."""
    try:
        def probe(x_ref, o_ref):
            o_ref[...] = x_ref[...] + 1.0

        x = jnp.zeros((2, 8, 128), jnp.float32)
        out = pl.pallas_call(
            probe,
            out_shape=jax.ShapeDtypeStruct((2, 8, 128), jnp.float32),
            grid_spec=pltpu.PrefetchScalarGridSpec(
                num_scalar_prefetch=0,
                grid=(2,),
                in_specs=[pl.BlockSpec((None, 8, 128), lambda b: (b, 0, 0))],
                out_specs=pl.BlockSpec((None, 8, 128), lambda b: (b, 0, 0)),
            ),
            compiler_params=pltpu.CompilerParams(
                dimension_semantics=(pltpu.CORE_PARALLEL,)),
        )(x)
        jax.block_until_ready(out)
        if not np.allclose(np.asarray(out), 1.0):
            return ("parallel",)
        return (pltpu.CORE_PARALLEL,)
    except Exception:
        return ("parallel",)


def _make_voronoi_kernel(c_in, H, W, H_pad, W_pad, use_xlu_roll, pack_state):
    """Build the per-batch propagation kernel for static shapes/config."""
    pad_rows = H_pad != H
    pad_cols = W_pad != W

    def kernel(x_ref, grad_ref, dist0_ref, mask0_ref, mask_out_ref):
        # ---- loop-invariant wrap-fix masks (only when an axis is padded) ----
        if pad_rows:
            row_ids = lax.broadcasted_iota(jnp.int32, (H_pad, W_pad), 0)
            row_first = row_ids == 0
            row_last = row_ids == (H - 1)
        if pad_cols:
            col_ids = lax.broadcasted_iota(jnp.int32, (H_pad, W_pad), 1)
            col_first = col_ids == 0
            col_last = col_ids == (W - 1)

        def _rot(a, s, axis):
            """Raw rotate by static s over the padded extent of `axis`."""
            size = H_pad if axis == 0 else W_pad
            s = s % size
            if s == 0:
                return a
            if use_xlu_roll:
                return pltpu.roll(a, s, axis=axis)
            if axis == 0:
                return jnp.concatenate([a[size - s:, :], a[:size - s, :]], axis=0)
            return jnp.concatenate([a[:, size - s:], a[:, :size - s]], axis=1)

        def _roll(a, shift, axis):
            """Circular roll by shift in {-1,+1} over the *logical* (H, W) torus.
            When an axis is padded the logical wrap is a select between two
            static rotates (no cross-lane/sublane broadcast); padded rows/cols
            hold don't-care values and never feed logical pixels."""
            if axis == 0:
                if not pad_rows:
                    return _rot(a, shift, 0)
                if shift == -1:   # out[r] = a[(r+1) % H]
                    return jnp.where(row_last, _rot(a, H - 1, 0), _rot(a, H_pad - 1, 0))
                # shift == +1:   out[r] = a[(r-1) % H]
                return jnp.where(row_first, _rot(a, H_pad - H + 1, 0), _rot(a, 1, 0))
            if not pad_cols:
                return _rot(a, shift, 1)
            if shift == -1:       # out[c] = a[(c+1) % W]
                return jnp.where(col_last, _rot(a, W - 1, 1), _rot(a, W_pad - 1, 1))
            # shift == +1:        out[c] = a[(c-1) % W]
            return jnp.where(col_first, _rot(a, W_pad - W + 1, 1), _rot(a, 1, 1))

        def roll_dir(a, dy, dx):
            return _roll(a, dy, 0) if dy != 0 else _roll(a, dx, 1)

        # ---- loop-invariant penalties (hoisted out of the propagation loop) --
        grad = grad_ref[...]                       # (Hp, Wp) f32
        g2 = grad * grad
        wgrad = (g2 * g2) * GRADIENT_WEIGHT        # grad ** 4 * gradient_weight

        x = x_ref[...]                             # (C_in, Hp, Wp) f32
        cd_up = jnp.zeros_like(grad)               # direction (-1, 0)
        cd_left = jnp.zeros_like(grad)             # direction (0, -1)
        for c in range(c_in):
            xc = x[c]
            cd_up = cd_up + jnp.abs(xc - _roll(xc, -1, 0))
            cd_left = cd_left + jnp.abs(xc - _roll(xc, -1, 1))
        cd_down = _roll(cd_up, 1, 0)               # direction (+1, 0)
        cd_right = _roll(cd_left, 1, 1)            # direction (0, +1)

        pens = (
            wgrad + cd_up * COLOR_WEIGHT,
            wgrad + cd_down * COLOR_WEIGHT,
            wgrad + cd_left * COLOR_WEIGHT,
            wgrad + cd_right * COLOR_WEIGHT,
        )

        # ---- propagation loop ------------------------------------------------
        if pack_state:
            # Lossy fast path: dist (>= 0 f32, bit pattern order-preserving) in
            # the high 24 bits, cluster id in the low 8 bits.  Single int32
            # carry -> 1 roll + add + minimum per direction.
            LOW = jnp.int32(ID_MASK)
            HIGH = jnp.int32(~ID_MASK)             # 0xFFFFFF00
            key0 = ((pltpu.bitcast(dist0_ref[...], jnp.int32) & HIGH)
                    | (mask0_ref[...] & LOW))

            def body(_, key):
                for d, (dy, dx) in enumerate(DIRECTIONS):
                    ks = roll_dir(key, dy, dx)
                    sd = pltpu.bitcast(ks & HIGH, jnp.float32)
                    wd = sd + pens[d]
                    wk = (pltpu.bitcast(wd, jnp.int32) & HIGH) | (ks & LOW)
                    key = jnp.minimum(wk, key)     # sign bit always 0 -> signed min OK
                return key

            key = lax.fori_loop(0, NUM_ITERS, body, key0)
            mid = key & LOW
            mask_out_ref[...] = jnp.where(mid == jnp.int32(ID_MASK), jnp.int32(-1), mid)
        else:
            # Exact path (bit-identical to the PyTorch update order).
            def body(_, carry):
                dist, mask = carry
                for d, (dy, dx) in enumerate(DIRECTIONS):
                    sd = roll_dir(dist, dy, dx)
                    sm = roll_dir(mask, dy, dx)
                    wd = sd + pens[d]
                    upd = wd < dist
                    dist = jnp.minimum(wd, dist)
                    mask = jnp.where(upd, sm, mask)
                return dist, mask

            _, mask = lax.fori_loop(0, NUM_ITERS, body,
                                    (dist0_ref[...], mask0_ref[...]))
            mask_out_ref[...] = mask

    return kernel


def distance_weighted_propagation(x, grad_map, dist0, mask0, *,
                                  pack_state=False, use_xlu_roll=None):
    B, C_in, H, W = x.shape
    H_pad = _round_up(H, _SUBLANE)
    W_pad = _round_up(W, _LANE)
    if use_xlu_roll is None:
        use_xlu_roll = _xlu_roll_available()

    if (H_pad, W_pad) != (H, W):
        ph, pw = H_pad - H, W_pad - W
        x = jnp.pad(x, ((0, 0), (0, 0), (0, ph), (0, pw)))
        grad_map = jnp.pad(grad_map, ((0, 0), (0, ph), (0, pw)))
        dist0 = jnp.pad(dist0, ((0, 0), (0, ph), (0, pw)),
                        constant_values=float("inf"))
        mask0 = jnp.pad(mask0, ((0, 0), (0, ph), (0, pw)), constant_values=-1)

    kernel = _make_voronoi_kernel(C_in, H, W, H_pad, W_pad,
                                  bool(use_xlu_roll), bool(pack_state))

    # VMEM headroom: only raise the scoped limit when the estimated per-program
    # footprint (double-buffered I/O + live temporaries) might exceed the
    # smallest default (16 MiB on v5e).  60 MiB stays under v7x's 64 MiB.
    # TODO(synk): for very large H*W on v7x also single-buffer x
    # (pipeline_mode=pl.Buffered(1)) and recompute cd_down/cd_right per iter.
    bytes_per_map = 4 * H_pad * W_pad
    est_vmem = bytes_per_map * (2 * (C_in + 4) + 24)
    cp_kwargs = {}
    if est_vmem > 16 * 1024 * 1024:
        cp_kwargs["vmem_limit_bytes"] = int(min(est_vmem, 60 * 1024 * 1024))

    mask = pl.pallas_call(
        kernel,
        out_shape=jax.ShapeDtypeStruct((B, H_pad, W_pad), jnp.int32),
        grid_spec=pltpu.PrefetchScalarGridSpec(
            num_scalar_prefetch=0,
            grid=(B,),
            in_specs=[
                pl.BlockSpec((None, C_in, H_pad, W_pad), lambda b: (b, 0, 0, 0)),
                pl.BlockSpec((None, H_pad, W_pad), lambda b: (b, 0, 0)),
                pl.BlockSpec((None, H_pad, W_pad), lambda b: (b, 0, 0)),
                pl.BlockSpec((None, H_pad, W_pad), lambda b: (b, 0, 0)),
            ],
            out_specs=pl.BlockSpec((None, H_pad, W_pad), lambda b: (b, 0, 0)),
        ),
        # mask0 (operand 3) and the mask output share one HBM buffer.
        input_output_aliases={3: 0},
        compiler_params=pltpu.CompilerParams(
            dimension_semantics=_batch_dim_semantics(),
            **cp_kwargs,
        ),
    )(x, grad_map, dist0, mask0)
    return mask[:, :H, :W]


class VoronoiPropagation:
    def __init__(self, num_clusters=196, height=224, width=224, pack_state=False):
        self.C = num_clusters
        self.H = height
        self.W = width
        self.std = self.C / (self.H * self.W) ** 0.5  # parity with torch; unused in forward
        # Lossy packed dist/mask state is opt-in (quantizes dist; needs C <= 255).
        self.pack_state = bool(pack_state) and num_clusters <= ID_MASK

    # --- glue: deterministic grid placement (pure python, static) ----------
    def place_centroids_on_grid(self, batch_size):
        num_cols = int(math.sqrt(self.C * self.W / self.H))
        num_rows = int(math.ceil(self.C / num_cols))
        gy = self.H / num_rows
        gx = self.W / num_cols
        centroids = []
        for i in range(num_rows):
            for j in range(num_cols):
                if len(centroids) >= self.C:
                    break
                centroids.append([int((i + 0.5) * gy), int((j + 0.5) * gx)])
            if len(centroids) >= self.C:
                break
        cents = jnp.asarray(np.array(centroids, dtype=np.int32))
        return jnp.broadcast_to(cents[None], (batch_size, self.C, 2))

    # --- glue: snap each centroid to the nearest local minimum of grad_map --
    # Windowed: only the (2*ns)^2 dynamic-slice neighborhood is scanned per
    # centroid (~400 px) instead of the full H*W map, preserving the clamped
    # torch window and its row-major / occupied-set tie-breaking.
    def find_nearest_minima(self, centroids, grad_map):
        H, W = self.H, self.W
        ns = NEIGHBORHOOD
        wh = min(2 * ns, H)
        ww = min(2 * ns, W)
        l_rows = jnp.arange(wh, dtype=jnp.int32)[:, None]
        l_cols = jnp.arange(ww, dtype=jnp.int32)[None, :]
        l_flat = jnp.arange(wh * ww, dtype=jnp.int32)

        def one_batch(grad2d, cents):
            def step(occupied, cen):
                y, x = cen[0], cen[1]
                y_min = jnp.maximum(0, y - ns)
                y_max = jnp.minimum(H, y + ns)
                x_min = jnp.maximum(0, x - ns)
                x_max = jnp.minimum(W, x + ns)
                sy = jnp.clip(y - ns, 0, H - wh)
                sx = jnp.clip(x - ns, 0, W - ww)
                g_win = lax.dynamic_slice(grad2d, (sy, sx), (wh, ww))
                o_win = lax.dynamic_slice(occupied, (sy, sx), (wh, ww))
                abs_r = sy + l_rows
                abs_c = sx + l_cols
                valid = ((abs_r >= y_min) & (abs_r < y_max)
                         & (abs_c >= x_min) & (abs_c < x_max))
                neigh = jnp.where(valid, g_win, jnp.inf)
                min_val = jnp.min(neigh)
                cand = valid & (g_win == min_val) & (~o_win)
                any_cand = jnp.any(cand)
                first = jnp.min(jnp.where(cand.reshape(-1), l_flat, wh * ww))
                first = jnp.minimum(first, wh * ww - 1)
                ny = sy + first // ww
                nx = sx + first % ww
                occupied = occupied.at[ny, nx].set(occupied[ny, nx] | any_cand)
                out_y = jnp.where(any_cand, ny, y)
                out_x = jnp.where(any_cand, nx, x)
                return occupied, jnp.stack([out_y, out_x])

            occ0 = jnp.zeros((H, W), dtype=bool)
            _, new_c = lax.scan(step, occ0, cents)
            return new_c

        return jax.vmap(one_batch)(grad_map, centroids)

    # --- glue: vectorized seed scatter (scatter-max == torch's later-index-wins)
    def _init_mask_dist(self, centroids):
        H, W, C = self.H, self.W, self.C
        B = centroids.shape[0]
        ys = centroids[:, :, 0]
        xs = centroids[:, :, 1]
        bidx = jnp.arange(B, dtype=jnp.int32)[:, None]
        ids = jnp.broadcast_to(jnp.arange(C, dtype=jnp.int32)[None, :], (B, C))
        mask0 = jnp.full((B, H, W), -1, jnp.int32).at[bidx, ys, xs].max(ids)
        dist0 = jnp.full((B, H, W), jnp.inf, jnp.float32).at[bidx, ys, xs].min(
            jnp.zeros((B, C), jnp.float32))
        return mask0, dist0

    def __call__(self, x, grad_map):
        B = x.shape[0]
        centroids = self.place_centroids_on_grid(B)
        centroids = self.find_nearest_minima(centroids, grad_map)
        mask0, dist0 = self._init_mask_dist(centroids)
        mask = distance_weighted_propagation(x, grad_map, dist0, mask0,
                                             pack_state=self.pack_state)
        # TODO(synk): torch returns int64 mask / mixed int-float centroids; JAX default is int32.
        return centroids, mask


def _reference_propagation(x, grad_map, dist0, mask0):
    """Pure-JAX replica of the propagation hot path (same f32 associativity as
    the exact kernel path: penalties hoisted), for correctness checking."""
    B, C_in, H, W = x.shape
    g2 = grad_map * grad_map
    wgrad = (g2 * g2) * GRADIENT_WEIGHT
    pens = []
    for (dy, dx) in DIRECTIONS:
        cd = jnp.zeros((B, H, W), jnp.float32)
        for c in range(C_in):
            xc = x[:, c]
            cd = cd + jnp.abs(xc - jnp.roll(xc, (dy, dx), axis=(1, 2)))
        pens.append(wgrad + cd * COLOR_WEIGHT)
    dist, mask = dist0, mask0
    for _ in range(NUM_ITERS):
        for d, (dy, dx) in enumerate(DIRECTIONS):
            sd = jnp.roll(dist, (dy, dx), axis=(1, 2))
            sm = jnp.roll(mask, (dy, dx), axis=(1, 2))
            wd = sd + pens[d]
            upd = wd < dist
            dist = jnp.where(upd, wd, dist)
            mask = jnp.where(upd, sm, mask)
    return mask


if __name__ == "__main__":
    key = jax.random.PRNGKey(0)
    k1, k2, k3, k4 = jax.random.split(key, 4)

    # ---- case 1: default path (exact state, probe-selected roll) -----------
    B, C_in, H, W = 2, 3, 16, 16
    num_clusters = 16
    x = jax.random.uniform(k1, (B, C_in, H, W), dtype=jnp.float32)
    grad_map = jax.random.uniform(k2, (B, H, W), dtype=jnp.float32)

    model = VoronoiPropagation(num_clusters=num_clusters, height=H, width=W)
    centroids, mask = model(x, grad_map)
    jax.block_until_ready((centroids, mask))
    assert centroids.shape == (B, num_clusters, 2)
    assert mask.shape == (B, H, W)

    mask0, dist0 = model._init_mask_dist(model.find_nearest_minima(
        model.place_centroids_on_grid(B), grad_map))
    mask_ref = _reference_propagation(x, grad_map, dist0, mask0)
    assert np.array_equal(np.asarray(mask), np.asarray(mask_ref)), \
        "mask mismatch vs reference"

    # ---- case 2: opt-in packed dist/mask state (lossy by design) ------------
    mask_packed = distance_weighted_propagation(x, grad_map, dist0, mask0,
                                                pack_state=True)
    jax.block_until_ready(mask_packed)
    assert mask_packed.shape == (B, H, W)
    agree = float(np.mean(np.asarray(mask_packed) == np.asarray(mask_ref)))
    assert agree >= 0.9, f"packed-state path agreement too low: {agree}"

    # ---- case 3: H not a multiple of 8 (pad_rows wrap fix), both roll paths -
    H2, W2, C2 = 12, 20, 9
    xb = jax.random.uniform(k3, (B, C_in, H2, W2), dtype=jnp.float32)
    gb = jax.random.uniform(k4, (B, H2, W2), dtype=jnp.float32)
    model2 = VoronoiPropagation(num_clusters=C2, height=H2, width=W2)
    cents2, m2 = model2(xb, gb)
    jax.block_until_ready((cents2, m2))
    assert cents2.shape == (B, C2, 2)
    assert m2.shape == (B, H2, W2)

    mask0b, dist0b = model2._init_mask_dist(model2.find_nearest_minima(
        model2.place_centroids_on_grid(B), gb))
    ref2 = _reference_propagation(xb, gb, dist0b, mask0b)
    assert np.array_equal(np.asarray(m2), np.asarray(ref2)), \
        "pad_rows / XLU-roll path mismatch vs reference"
    m_cat = distance_weighted_propagation(xb, gb, dist0b, mask0b,
                                          use_xlu_roll=False)
    jax.block_until_ready(m_cat)
    assert np.array_equal(np.asarray(m_cat), np.asarray(ref2)), \
        "concatenate-fallback roll path mismatch vs reference"

    print("KERNEL_OK")
</pallas_src>

<mosaic_0001>
module attributes {stable_mosaic.version = 11 : i64} {
  func.func @probe_kernel(%arg0: memref<16x256xf32, #tpu.memory_space<vmem>>, %arg1: memref<16x256xf32, #tpu.memory_space<vmem>>) attributes {dimension_semantics = [], scalar_prefetch = 0 : i64, scratch_operands = 0 : i64, tpu.core_type = #tpu.core_type<tc>} {
    %c0 = arith.constant 0 : index
    %c0_0 = arith.constant 0 : index
    %0 = vector.load %arg0[%c0, %c0_0] : memref<16x256xf32, #tpu.memory_space<vmem>>, vector<16x256xf32>
    %c1_i32 = arith.constant 1 : i32
    %1 = tpu.dynamic_rotate %0 by %c1_i32 dim 0 : vector<16x256xf32>, i32 -> vector<16x256xf32>
    %c15_i32 = arith.constant 15 : i32
    %2 = tpu.dynamic_rotate %1 by %c15_i32 dim 0 : vector<16x256xf32>, i32 -> vector<16x256xf32>
    %c1_i32_1 = arith.constant 1 : i32
    %3 = tpu.dynamic_rotate %2 by %c1_i32_1 dim 1 : vector<16x256xf32>, i32 -> vector<16x256xf32>
    %c255_i32 = arith.constant 255 : i32
    %4 = tpu.dynamic_rotate %3 by %c255_i32 dim 1 : vector<16x256xf32>, i32 -> vector<16x256xf32>
    %c0_2 = arith.constant 0 : index
    %c0_3 = arith.constant 0 : index
    %5 = vector.load %arg0[%c0_2, %c0_3] : memref<16x256xf32, #tpu.memory_space<vmem>>, vector<16x256xf32>
    %c1_i32_4 = arith.constant 1 : i32
    %6 = tpu.dynamic_rotate %5 by %c1_i32_4 dim 0 : vector<16x256xf32>, i32 -> vector<16x256xf32>
    %c1_i32_5 = arith.constant 1 : i32
    %7 = tpu.dynamic_rotate %6 by %c1_i32_5 dim 1 : vector<16x256xf32>, i32 -> vector<16x256xf32>
    %8 = arith.addf %4, %7 : vector<16x256xf32>
    %c0_6 = arith.constant 0 : index
    %c0_7 = arith.constant 0 : index
    %9 = vector.load %arg1[%c0_6, %c0_7] : memref<16x256xf32, #tpu.memory_space<vmem>>, vector<16x256xf32>
    tpu.vector_store %arg1[%c0_6, %c0_7], %8 {strides = array<i32>} : memref<16x256xf32, #tpu.memory_space<vmem>>, vector<16x256xf32>,
    return
  }
}

module attributes {stable_mosaic.version = 11 : i64} {
  func.func @probe(%arg0: i32, %arg1: memref<1x8x128xf32, #tpu.memory_space<vmem>>, %arg2: memref<1x8x128xf32, #tpu.memory_space<vmem>>) attributes {dimension_semantics = [#tpu.dimension_semantics<core_parallel>], iteration_bounds = array<i64: 2>, scalar_prefetch = 0 : i64, scratch_operands = 0 : i64, tpu.core_type = #tpu.core_type<tc>, window_params = [{transform_indices = @transform_0, window_bounds = array<i64: 1, 8, 128>}, {transform_indices = @transform_1, window_bounds = array<i64: 1, 8, 128>}]} {
    %c0 = arith.constant 0 : index
    %c0_0 = arith.constant 0 : index
    %c0_1 = arith.constant 0 : index
    %0 = vector.load %arg1[%c0, %c0_0, %c0_1] : memref<1x8x128xf32, #tpu.memory_space<vmem>>, vector<1x8x128xf32>
    %1 = vector.shape_cast %0 : vector<1x8x128xf32> to vector<8x128xf32>
    %cst = arith.constant 1.000000e+00 : f32
    %2 = vector.broadcast %cst : f32 to vector<8x128xf32>
    %3 = arith.addf %1, %2 : vector<8x128xf32>
    %c0_2 = arith.constant 0 : index
    %c0_3 = arith.constant 0 : index
    %c0_4 = arith.constant 0 : index
    %4 = vector.load %arg2[%c0_2, %c0_3, %c0_4] : memref<1x8x128xf32, #tpu.memory_space<vmem>>, vector<1x8x128xf32>
    %5 = vector.shape_cast %4 : vector<1x8x128xf32> to vector<8x128xf32>
    %6 = vector.shape_cast %3 : vector<8x128xf32> to vector<1x8x128xf32>
    tpu.vector_store %arg2[%c0_2, %c0_3, %c0_4], %6 {strides = array<i32>} : memref<1x8x128xf32, #tpu.memory_space<vmem>>, vector<1x8x128xf32>,
    return
  }
  func.func @transform_0(%arg0: i32) -> (i32, i32, i32) {
    %c0_i32 = arith.constant 0 : i32
    %c0_i32_0 = arith.constant 0 : i32
    %c0_i32_1 = arith.constant 0 : i32
    return %arg0, %c0_i32, %c0_i32_0 : i32, i32, i32
  }
  func.func @transform_1(%arg0: i32) -> (i32, i32, i32) {
    %c0_i32 = arith.constant 0 : i32
    %c0_i32_0 = arith.constant 0 : i32
    %c0_i32_1 = arith.constant 0 : i32
    return %arg0, %c0_i32, %c0_i32_0 : i32, i32, i32
  }
}

module attributes {stable_mosaic.version = 11 : i64} {
  func.func @kernel(%arg0: i32, %arg1: memref<1x3x16x128xf32, #tpu.memory_space<vmem>>, %arg2: memref<1x16x128xf32, #tpu.memory_space<vmem>>, %arg3: memref<1x16x128xf32, #tpu.memory_space<vmem>>, %arg4: memref<1x16x128xi32, #tpu.memory_space<vmem>>, %arg5: memref<1x16x128xi32, #tpu.memory_space<vmem>>) attributes {dimension_semantics = [#tpu.dimension_semantics<parallel>], iteration_bounds = array<i64: 2>, scalar_prefetch = 0 : i64, scratch_operands = 0 : i64, tpu.core_type = #tpu.core_type<tc>, window_params = [{transform_indices = @transform_0, window_bounds = array<i64: 1, 3, 16, 128>}, {transform_indices = @transform_1, window_bounds = array<i64: 1, 16, 128>}, {transform_indices = @transform_2, window_bounds = array<i64: 1, 16, 128>}, {transform_indices = @transform_3, window_bounds = array<i64: 1, 16, 128>}, {transform_indices = @transform_4, window_bounds = array<i64: 1, 16, 128>}]} {
    %0 = tpu.iota {dimensions = array<i32: 1>} : vector<16x128xi32>
    %c0_i32 = arith.constant 0 : i32
    %1 = vector.broadcast %c0_i32 : i32 to vector<16x128xi32>
    %2 = arith.cmpi eq, %0, %1 : vector<16x128xi32>
    %c15_i32 = arith.constant 15 : i32
    %3 = vector.broadcast %c15_i32 : i32 to vector<16x128xi32>
    %4 = arith.cmpi eq, %0, %3 : vector<16x128xi32>
    %c0 = arith.constant 0 : index
    %c0_0 = arith.constant 0 : index
    %c0_1 = arith.constant 0 : index
    %5 = vector.load %arg2[%c0, %c0_0, %c0_1] : memref<1x16x128xf32, #tpu.memory_space<vmem>>, vector<1x16x128xf32>
    %6 = vector.shape_cast %5 : vector<1x16x128xf32> to vector<16x128xf32>
    %7 = arith.mulf %6, %6 : vector<16x128xf32>
    %8 = arith.mulf %7, %7 : vector<16x128xf32>
    %cst = arith.constant 1.000000e+01 : f32
    %9 = vector.broadcast %cst : f32 to vector<16x128xf32>
    %10 = arith.mulf %8, %9 : vector<16x128xf32>
    %c0_2 = arith.constant 0 : index
    %c0_3 = arith.constant 0 : index
    %c0_4 = arith.constant 0 : index
    %c0_5 = arith.constant 0 : index
    %11 = vector.load %arg1[%c0_2, %c0_3, %c0_4, %c0_5] : memref<1x3x16x128xf32, #tpu.memory_space<vmem>>, vector<1x3x16x128xf32>
    %12 = vector.shape_cast %11 : vector<1x3x16x128xf32> to vector<3x16x128xf32>
    %cst_6 = arith.constant 0.000000e+00 : f32
    %13 = vector.broadcast %cst_6 : f32 to vector<16x128xf32>
    %cst_7 = arith.constant 0.000000e+00 : f32
    %14 = vector.broadcast %cst_7 : f32 to vector<16x128xf32>
    %15 = vector.extract_strided_slice %12 {offsets = [0, 0, 0], sizes = [1, 16, 128], strides = [1, 1, 1]} : vector<3x16x128xf32> to vector<1x16x128xf32>
    %16 = vector.shape_cast %15 : vector<1x16x128xf32> to vector<16x128xf32>
    %17 = vector.extract_strided_slice %16 {offsets = [1, 0], sizes = [15, 128], strides = [1, 1]} : vector<16x128xf32> to vector<15x128xf32>
    %18 = vector.extract_strided_slice %16 {offsets = [0, 0], sizes = [1, 128], strides = [1, 1]} : vector<16x128xf32> to vector<1x128xf32>
    %19 = tpu.concatenate %17, %18 in 0 : vector<15x128xf32>, vector<1x128xf32> -> vector<16x128xf32>
    %20 = arith.subf %16, %19 : vector<16x128xf32>
    %21 = math.absf %20 : vector<16x128xf32>
    %22 = arith.addf %13, %21 : vector<16x128xf32>
    %23 = vector.extract_strided_slice %16 {offsets = [0, 113], sizes = [16, 15], strides = [1, 1]} : vector<16x128xf32> to vector<16x15xf32>
    %24 = vector.extract_strided_slice %16 {offsets = [0, 0], sizes = [16, 113], strides = [1, 1]} : vector<16x128xf32> to vector<16x113xf32>
    %25 = tpu.concatenate %23, %24 in 1 : vector<16x15xf32>, vector<16x113xf32> -> vector<16x128xf32>
    %26 = vector.extract_strided_slice %16 {offsets = [0, 1], sizes = [16, 127], strides = [1, 1]} : vector<16x128xf32> to vector<16x127xf32>
    %27 = vector.extract_strided_slice %16 {offsets = [0, 0], sizes = [16, 1], strides = [1, 1]} : vector<16x128xf32> to vector<16x1xf32>
    %28 = tpu.concatenate %26, %27 in 1 : vector<16x127xf32>, vector<16x1xf32> -> vector<16x128xf32>
    %29 = arith.select %4, %25, %28 : vector<16x128xi1>, vector<16x128xf32>
    %30 = arith.subf %16, %29 : vector<16x128xf32>
    %31 = math.absf %30 : vector<16x128xf32>
    %32 = arith.addf %14, %31 : vector<16x128xf32>
    %33 = vector.extract_strided_slice %12 {offsets = [1, 0, 0], sizes = [1, 16, 128], strides = [1, 1, 1]} : vector<3x16x128xf32> to vector<1x16x128xf32>
    %34 = vector.shape_cast %33 : vector<1x16x128xf32> to vector<16x128xf32>
    %35 = vector.extract_strided_slice %34 {offsets = [1, 0], sizes = [15, 128], strides = [1, 1]} : vector<16x128xf32> to vector<15x128xf32>
    %36 = vector.extract_strided_slice %34 {offsets = [0, 0], sizes = [1, 128], strides = [1, 1]} : vector<16x128xf32> to vector<1x128xf32>
    %37 = tpu.concatenate %35, %36 in 0 : vector<15x128xf32>, vector<1x128xf32> -> vector<16x128xf32>
    %38 = arith.subf %34, %37 : vector<16x128xf32>
    %39 = math.absf %38 : vector<16x128xf32>
    %40 = arith.addf %22, %39 : vector<16x128xf32>
    %41 = vector.extract_strided_slice %34 {offsets = [0, 113], sizes = [16, 15], strides = [1, 1]} : vector<16x128xf32> to vector<16x15xf32>
    %42 = vector.extract_strided_slice %34 {offsets = [0, 0], sizes = [16, 113], strides = [1, 1]} : vector<16x128xf32> to vector<16x113xf32>
    %43 = tpu.concatenate %41, %42 in 1 : vector<16x15xf32>, vector<16x113xf32> -> vector<16x128xf32>
    %44 = vector.extract_strided_slice %34 {offsets = [0, 1], sizes = [16, 127], strides = [1, 1]} : vector<16x128xf32> to vector<16x127xf32>
    %45 = vector.extract_strided_slice %34 {offsets = [0, 0], sizes = [16, 1], strides = [1, 1]} : vector<16x128xf32> to vector<16x1xf32>
    %46 = tpu.concatenate %44, %45 in 1 : vector<16x127xf32>, vector<16x1xf32> -> vector<16x128xf32>
    %47 = arith.select %4, %43, %46 : vector<16x128xi1>, vector<16x128xf32>
    %48 = arith.subf %34, %47 : vector<16x128xf32>
    %49 = math.absf %48 : vector<16x128xf32>
    %50 = arith.addf %32, %49 : vector<16x128xf32>
    %51 = vector.extract_strided_slice %12 {offsets = [2, 0, 0], sizes = [1, 16, 128], strides = [1, 1, 1]} : vector<3x16x128xf32> to vector<1x16x128xf32>
    %52 = vector.shape_cast %51 : vector<1x16x128xf32> to vector<16x128xf32>
    %53 = vector.extract_strided_slice %52 {offsets = [1, 0], sizes = [15, 128], strides = [1, 1]} : vector<16x128xf32> to vector<15x128xf32>
    %54 = vector.extract_strided_slice %52 {offsets = [0, 0], sizes = [1, 128], strides = [1, 1]} : vector<16x128xf32> to vector<1x128xf32>
    %55 = tpu.concatenate %53, %54 in 0 : vector<15x128xf32>, vector<1x128xf32> -> vector<16x128xf32>
    %56 = arith.subf %52, %55 : vector<16x128xf32>
    %57 = math.absf %56 : vector<16x128xf32>
    %58 = arith.addf %40, %57 : vector<16x128xf32>
    %59 = vector.extract_strided_slice %52 {offsets = [0, 113], sizes = [16, 15], strides = [1, 1]} : vector<16x128xf32> to vector<16x15xf32>
    %60 = vector.extract_strided_slice %52 {offsets = [0, 0], sizes = [16, 113], strides = [1, 1]} : vector<16x128xf32> to vector<16x113xf32>
    %61 = tpu.concatenate %59, %60 in 1 : vector<16x15xf32>, vector<16x113xf32> -> vector<16x128xf32>
    %62 = vector.extract_strided_slice %52 {offsets = [0, 1], sizes = [16, 127], strides = [1, 1]} : vector<16x128xf32> to vector<16x127xf32>
    %63 = vector.extract_strided_slice %52 {offsets = [0, 0], sizes = [16, 1], strides = [1, 1]} : vector<16x128xf32> to vector<16x1xf32>
    %64 = tpu.concatenate %62, %63 in 1 : vector<16x127xf32>, vector<16x1xf32> -> vector<16x128xf32>
    %65 = arith.select %4, %61, %64 : vector<16x128xi1>, vector<16x128xf32>
    %66 = arith.subf %52, %65 : vector<16x128xf32>
    %67 = math.absf %66 : vector<16x128xf32>
    %68 = arith.addf %50, %67 : vector<16x128xf32>
    %69 = vector.extract_strided_slice %58 {offsets = [15, 0], sizes = [1, 128], strides = [1, 1]} : vector<16x128xf32> to vector<1x128xf32>
    %70 = vector.extract_strided_slice %58 {offsets = [0, 0], sizes = [15, 128], strides = [1, 1]} : vector<16x128xf32> to vector<15x128xf32>
    %71 = tpu.concatenate %69, %70 in 0 : vector<1x128xf32>, vector<15x128xf32> -> vector<16x128xf32>
    %72 = vector.extract_strided_slice %68 {offsets = [0, 15], sizes = [16, 113], strides = [1, 1]} : vector<16x128xf32> to vector<16x113xf32>
    %73 = vector.extract_strided_slice %68 {offsets = [0, 0], sizes = [16, 15], strides = [1, 1]} : vector<16x128xf32> to vector<16x15xf32>
    %74 = tpu.concatenate %72, %73 in 1 : vector<16x113xf32>, vector<16x15xf32> -> vector<16x128xf32>
    %75 = vector.extract_strided_slice %68 {offsets = [0, 127], sizes = [16, 1], strides = [1, 1]} : vector<16x128xf32> to vector<16x1xf32>
    %76 = vector.extract_strided_slice %68 {offsets = [0, 0], sizes = [16, 127], strides = [1, 1]} : vector<16x128xf32> to vector<16x127xf32>
    %77 = tpu.concatenate %75, %76 in 1 : vector<16x1xf32>, vector<16x127xf32> -> vector<16x128xf32>
    %78 = arith.select %2, %74, %77 : vector<16x128xi1>, vector<16x128xf32>
    %cst_8 = arith.constant 1.000000e+01 : f32
    %79 = vector.broadcast %cst_8 : f32 to vector<16x128xf32>
    %80 = arith.mulf %58, %79 : vector<16x128xf32>
    %81 = arith.addf %10, %80 : vector<16x128xf32>
    %cst_9 = arith.constant 1.000000e+01 : f32
    %82 = vector.broadcast %cst_9 : f32 to vector<16x128xf32>
    %83 = arith.mulf %71, %82 : vector<16x128xf32>
    %84 = arith.addf %10, %83 : vector<16x128xf32>
    %cst_10 = arith.constant 1.000000e+01 : f32
    %85 = vector.broadcast %cst_10 : f32 to vector<16x128xf32>
    %86 = arith.mulf %68, %85 : vector<16x128xf32>
    %87 = arith.addf %10, %86 : vector<16x128xf32>
    %cst_11 = arith.constant 1.000000e+01 : f32
    %88 = vector.broadcast %cst_11 : f32 to vector<16x128xf32>
    %89 = arith.mulf %78, %88 : vector<16x128xf32>
    %90 = arith.addf %10, %89 : vector<16x128xf32>
    %c0_12 = arith.constant 0 : index
    %c0_13 = arith.constant 0 : index
    %c0_14 = arith.constant 0 : index
    %91 = vector.load %arg3[%c0_12, %c0_13, %c0_14] : memref<1x16x128xf32, #tpu.memory_space<vmem>>, vector<1x16x128xf32>
    %92 = vector.shape_cast %91 : vector<1x16x128xf32> to vector<16x128xf32>
    %c0_15 = arith.constant 0 : index
    %c0_16 = arith.constant 0 : index
    %c0_17 = arith.constant 0 : index
    %93 = vector.load %arg4[%c0_15, %c0_16, %c0_17] : memref<1x16x128xi32, #tpu.memory_space<vmem>>, vector<1x16x128xi32>
    %94 = vector.shape_cast %93 : vector<1x16x128xi32> to vector<16x128xi32>
    %c0_i32_18 = arith.constant 0 : i32
    %c50_i32 = arith.constant 50 : i32
    %95 = arith.addi %c0_i32_18, %c50_i32 : i32
    %c1_i32 = arith.constant 1 : i32
    %96:2 = scf.for %arg6 = %c0_i32_18 to %95 step %c1_i32 iter_args(%arg7 = %92, %arg8 = %94) -> (vector<16x128xf32>, vector<16x128xi32>)  : i32 {
      %100 = vector.extract_strided_slice %arg7 {offsets = [1, 0], sizes = [15, 128], strides = [1, 1]} : vector<16x128xf32> to vector<15x128xf32>
      %101 = vector.extract_strided_slice %arg7 {offsets = [0, 0], sizes = [1, 128], strides = [1, 1]} : vector<16x128xf32> to vector<1x128xf32>
      %102 = tpu.concatenate %100, %101 in 0 : vector<15x128xf32>, vector<1x128xf32> -> vector<16x128xf32>
      %103 = vector.extract_strided_slice %arg8 {offsets = [1, 0], sizes = [15, 128], strides = [1, 1]} : vector<16x128xi32> to vector<15x128xi32>
      %104 = vector.extract_strided_slice %arg8 {offsets = [0, 0], sizes = [1, 128], strides = [1, 1]} : vector<16x128xi32> to vector<1x128xi32>
      %105 = tpu.concatenate %103, %104 in 0 : vector<15x128xi32>, vector<1x128xi32> -> vector<16x128xi32>
      %106 = arith.addf %102, %81 : vector<16x128xf32>
      %107 = arith.cmpf olt, %106, %arg7 : vector<16x128xf32>
      %108 = arith.minimumf %106, %arg7 : vector<16x128xf32>
      %109 = arith.select %107, %105, %arg8 : vector<16x128xi1>, vector<16x128xi32>
      %110 = vector.extract_strided_slice %108 {offsets = [15, 0], sizes = [1, 128], strides = [1, 1]} : vector<16x128xf32> to vector<1x128xf32>
      %111 = vector.extract_strided_slice %108 {offsets = [0, 0], sizes = [15, 128], strides = [1, 1]} : vector<16x128xf32> to vector<15x128xf32>
      %112 = tpu.concatenate %110, %111 in 0 : vector<1x128xf32>, vector<15x128xf32> -> vector<16x128xf32>
      %113 = vector.extract_strided_slice %109 {offsets = [15, 0], sizes = [1, 128], strides = [1, 1]} : vector<16x128xi32> to vector<1x128xi32>
      %114 = vector.extract_strided_slice %109 {offsets = [0, 0], sizes = [15, 128], strides = [1, 1]} : vector<16x128xi32> to vector<15x128xi32>
      %115 = tpu.concatenate %113, %114 in 0 : vector<1x128xi32>, vector<15x128xi32> -> vector<16x128xi32>
      %116 = arith.addf %112, %84 : vector<16x128xf32>
      %117 = arith.cmpf olt, %116, %108 : vector<16x128xf32>
      %118 = arith.minimumf %116, %108 : vector<16x128xf32>
      %119 = arith.select %117, %115, %109 : vector<16x128xi1>, vector<16x128xi32>
      %120 = vector.extract_strided_slice %118 {offsets = [0, 113], sizes = [16, 15], strides = [1, 1]} : vector<16x128xf32> to vector<16x15xf32>
      %121 = vector.extract_strided_slice %118 {offsets = [0, 0], sizes = [16, 113], strides = [1, 1]} : vector<16x128xf32> to vector<16x113xf32>
      %122 = tpu.concatenate %120, %121 in 1 : vector<16x15xf32>, vector<16x113xf32> -> vector<16x128xf32>
      %123 = vector.extract_strided_slice %118 {offsets = [0, 1], sizes = [16, 127], strides = [1, 1]} : vector<16x128xf32> to vector<16x127xf32>
      %124 = vector.extract_strided_slice %118 {offsets = [0, 0], sizes = [16, 1], strides = [1, 1]} : vector<16x128xf32> to vector<16x1xf32>
      %125 = tpu.concatenate %123, %124 in 1 : vector<16x127xf32>, vector<16x1xf32> -> vector<16x128xf32>
      %126 = arith.select %4, %122, %125 : vector<16x128xi1>, vector<16x128xf32>
      %127 = vector.extract_strided_slice %119 {offsets = [0, 113], sizes = [16, 15], strides = [1, 1]} : vector<16x128xi32> to vector<16x15xi32>
      %128 = vector.extract_strided_slice %119 {offsets = [0, 0], sizes = [16, 113], strides = [1, 1]} : vector<16x128xi32> to vector<16x113xi32>
      %129 = tpu.concatenate %127, %128 in 1 : vector<16x15xi32>, vector<16x113xi32> -> vector<16x128xi32>
      %130 = vector.extract_strided_slice %119 {offsets = [0, 1], sizes = [16, 127], strides = [1, 1]} : vector<16x128xi32> to vector<16x127xi32>
      %131 = vector.extract_strided_slice %119 {offsets = [0, 0], sizes = [16, 1], strides = [1, 1]} : vector<16x128xi32> to vector<16x1xi32>
      %132 = tpu.concatenate %130, %131 in 1 : vector<16x127xi32>, vector<16x1xi32> -> vector<16x128xi32>
      %133 = arith.select %4, %129, %132 : vector<16x128xi1>, vector<16x128xi32>
      %134 = arith.addf %126, %87 : vector<16x128xf32>
      %135 = arith.cmpf olt, %134, %118 : vector<16x128xf32>
      %136 = arith.minimumf %134, %118 : vector<16x128xf32>
      %137 = arith.select %135, %133, %119 : vector<16x128xi1>, vector<16x128xi32>
      %138 = vector.extract_strided_slice %136 {offsets = [0, 15], sizes = [16, 113], strides = [1, 1]} : vector<16x128xf32> to vector<16x113xf32>
      %139 = vector.extract_strided_slice %136 {offsets = [0, 0], sizes = [16, 15], strides = [1, 1]} : vector<16x128xf32> to vector<16x15xf32>
      %140 = tpu.concatenate %138, %139 in 1 : vector<16x113xf32>, vector<16x15xf32> -> vector<16x128xf32>
      %141 = vector.extract_strided_slice %136 {offsets = [0, 127], sizes = [16, 1], strides = [1, 1]} : vector<16x128xf32> to vector<16x1xf32>
      %142 = vector.extract_strided_slice %136 {offsets = [0, 0], sizes = [16, 127], strides = [1, 1]} : vector<16x128xf32> to vector<16x127xf32>
      %143 = tpu.concatenate %141, %142 in 1 : vector<16x1xf32>, vector<16x127xf32> -> vector<16x128xf32>
      %144 = arith.select %2, %140, %143 : vector<16x128xi1>, vector<16x128xf32>
      %145 = vector.extract_strided_slice %137 {offsets = [0, 15], sizes = [16, 113], strides = [1, 1]} : vector<16x128xi32> to vector<16x113xi32>
      %146 = vector.extract_strided_slice %137 {offsets = [0, 0], sizes = [16, 15], strides = [1, 1]} : vector<16x128xi32> to vector<16x15xi32>
      %147 = tpu.concatenate %145, %146 in 1 : vector<16x113xi32>, vector<16x15xi32> -> vector<16x128xi32>
      %148 = vector.extract_strided_slice %137 {offsets = [0, 127], sizes = [16, 1], strides = [1, 1]} : vector<16x128xi32> to vector<16x1xi32>
      %149 = vector.extract_strided_slice %137 {offsets = [0, 0], sizes = [16, 127], strides = [1, 1]} : vector<16x128xi32> to vector<16x127xi32>
      %150 = tpu.concatenate %148, %149 in 1 : vector<16x1xi32>, vector<16x127xi32> -> vector<16x128xi32>
      %151 = arith.select %2, %147, %150 : vector<16x128xi1>, vector<16x128xi32>
      %152 = arith.addf %144, %90 : vector<16x128xf32>
      %153 = arith.cmpf olt, %152, %136 : vector<16x128xf32>
      %154 = arith.minimumf %152, %136 : vector<16x128xf32>
      %155 = arith.select %153, %151, %137 : vector<16x128xi1>, vector<16x128xi32>
      scf.yield %154, %155 : vector<16x128xf32>, vector<16x128xi32>
    }
    %c0_19 = arith.constant 0 : index
    %c0_20 = arith.constant 0 : index
    %c0_21 = arith.constant 0 : index
    %97 = vector.load %arg5[%c0_19, %c0_20, %c0_21] : memref<1x16x128xi32, #tpu.memory_space<vmem>>, vector<1x16x128xi32>
    %98 = vector.shape_cast %97 : vector<1x16x128xi32> to vector<16x128xi32>
    %99 = vector.shape_cast %96#1 : vector<16x128xi32> to vector<1x16x128xi32>
    tpu.vector_store %arg5[%c0_19, %c0_20, %c0_21], %99 {strides = array<i32>} : memref<1x16x128xi32, #tpu.memory_space<vmem>>, vector<1x16x128xi32>,
    return
  }
  func.func @transform_0(%arg0: i32) -> (i32, i32, i32, i32) {
    %c0_i32 = arith.constant 0 : i32
    %c0_i32_0 = arith.constant 0 : i32
    %c0_i32_1 = arith.constant 0 : i32
    %c0_i32_2 = arith.constant 0 : i32
    return %arg0, %c0_i32, %c0_i32_0, %c0_i32_1 : i32, i32, i32, i32
  }
  func.func @transform_1(%arg0: i32) -> (i32, i32, i32) {
    %c0_i32 = arith.constant 0 : i32
    %c0_i32_0 = arith.constant 0 : i32
    %c0_i32_1 = arith.constant 0 : i32
    return %arg0, %c0_i32, %c0_i32_0 : i32, i32, i32
  }
  func.func @transform_2(%arg0: i32) -> (i32, i32, i32) {
    %c0_i32 = arith.constant 0 : i32
    %c0_i32_0 = arith.constant 0 : i32
    %c0_i32_1 = arith.constant 0 : i32
    return %arg0, %c0_i32, %c0_i32_0 : i32, i32, i32
  }
  func.func @transform_3(%arg0: i32) -> (i32, i32, i32) {
    %c0_i32 = arith.constant 0 : i32
    %c0_i32_0 = arith.constant 0 : i32
    %c0_i32_1 = arith.constant 0 : i32
    return %arg0, %c0_i32, %c0_i32_0 : i32, i32, i32
  }
  func.func @transform_4(%arg0: i32) -> (i32, i32, i32) {
    %c0_i32 = arith.constant 0 : i32
    %c0_i32_0 = arith.constant 0 : i32
    %c0_i32_1 = arith.constant 0 : i32
    return %arg0, %c0_i32, %c0_i32_0 : i32, i32, i32
  }
}

</mosaic_0001>

<bundles_post_ra>
// kernel: tpu_custom_call.1
= control target key start
LH: loop header
LB: loop body
LE: loop exit
PB: predicated region body
PF: predicated region fallthrough
CT: control target
= control target key end

     0   :  { %6 = vsyncpa [#allocation3], 0  ;;  %s220_s0 = inlined_call_operand.hbm [shape: f32[16,256], index: 0, kind: input, shape index: {}]   ;;  %s221_s1 = inlined_call_operand.hbm [shape: f32[16,256], index: 1, kind: output, shape index: {}]  }
   0x1   :  { %7 = vsyncpa [#allocation4], 0  ;;  %s166_s6 = smov [#allocation2]   ;;  %s118_s10 = scalar_lea.hbm %s220_s0, 512 }
   0x2   :  { %s13_s7 = sshll.u32 %s166_s6, 4  ;;  %p119_p0 = scmp.ne.s32.totalorder %s220_s0, %s118_s10  ;;  %s14_s7 = int_to_ptr.vmem [resolvable:$true] %s13_s7 }
   0x3   :  { %p122_p1 = scmp.lt.u32.totalorder %s118_s10, %s220_s0 }
   0x5   :  { %p124_p2 = pnand %p122_p1, %p119_p0 }
   0x7   :  { %127 = shalt.err (!%p124_p2)
}
   0x8   :  { %s128_s15 = scalar_lea.vmem %s14_s7, 512  ;;  %p133_p4 = scmp.lt.s32.totalorder %s14_s7, %s14_s7 }
   0x9   :  { %p129_p3 = scmp.ne.s32.totalorder %s14_s7, %s128_s15  ;;  %p134_p5 = scmp.lt.s32.totalorder %s128_s15, %s128_s15 }
   0xb   :  { %p135_p6 = por %p134_p5, %p133_p4 }
   0xd   :  { %p136_p7 = pnand %p135_p6, %p129_p3 }
   0xf   :  { %139 = shalt.err (!%p136_p7)
}
  0x10   :  { %s167_s16 = smov 256   ;;  %s168_s17 = smov 16  }
  0x11   :  { %19 = dma.hbm_to_vmem [thread:$0]  %s220_s0, 512, %s14_s7, [#allocation3], %s167_s16, %s167_s16, %s168_s17  }
  0x12   :  { %162 = dma.done.wait [#allocation3], 512  }
  0x13   :  { %163 = vsyncadd [#allocation3], 4294966784  ;;  %v31_v0 = vlaneseq  ;;  %v24_v2 = vld [vmem:[#allocation2 + $0x8] sm:$0xff]  ;;  %v26_v3 = vld [vmem:[#allocation2 + $0x18] sm:$0xff]  ;;  %s169_s0 = smov 1   ;;  %s170_s20 = smov 127  }
  0x14   :  { %v23_v4 = vld [vmem:[#allocation2] sm:$0xff]  ;;  %v28_v5 = vrot.slane %v24_v2, 7  ;;  %v30_v6 = vrot.slane %v26_v3, 7  ;;  %v25_v7 = vld [vmem:[#allocation2 + $0x10] sm:$0xff]  ;;  %s171_s21 = smov [#allocation5]  }
  0x15   :  { %v32_v1 = vshrl.u32 %v31_v0, 7  ;;  %v27_v8 = vrot.slane %v23_v4, 7  ;;  %v29_v9 = vrot.slane %v25_v7, 7  ;;  %v56_v22 = vand.u32 127, %v31_v0  ;;  %s100_s22 = sshll.u32 %s171_s21, 4  ;;  %s101_s22 = int_to_ptr.vmem [resolvable:$true] %s100_s22 }
  0x16   :  { %s140_s23 = scalar_lea.vmem %s101_s22, 512  ;;  %p145_p9 = scmp.lt.s32.totalorder %s101_s22, %s101_s22 }
  0x17   :  { %vm33_vm0 = vcmp.lt.s32.totalorder %v32_v1, 1  ;;  %vm42_vm1 = vcmp.lt.s32.totalorder %v32_v1, 7  ;;  %vm57_vm2 = vcmp.lt.s32.totalorder %v56_v22, 1  ;;  %vm70_vm3 = vcmp.lt.s32.totalorder %v56_v22, 127  ;;  %p141_p8 = scmp.ne.s32.totalorder %s101_s22, %s140_s23  ;;  %p146_p10 = scmp.lt.s32.totalorder %s140_s23, %s140_s23 }
  0x18   :  { %v35_v10 = vsel %vm33_vm0, %v28_v5, %v30_v6  ;;  %v37_v11 = vsel %vm33_vm0, %v30_v6, %v28_v5  ;;  %v34_v14 = vsel %vm33_vm0, %v27_v8, %v29_v9  ;;  %v36_v15 = vsel %vm33_vm0, %v29_v9, %v27_v8 }
  0x19   :  { %v39_v12 = vrot.slane %v37_v11, 1  ;;  %v41_v13 = vrot.slane %v35_v10, 1  ;;  %v38_v16 = vrot.slane %v36_v15, 1  ;;  %v40_v17 = vrot.slane %v34_v14, 1  ;;  %p147_p11 = por %p146_p10, %p145_p9 }
  0x1b   :  { %v44_v18 = vsel %vm42_vm1, %v39_v12, %v41_v13  ;;  %v43_v19 = vsel %vm42_vm1, %v38_v16, %v40_v17  ;;  %v46_v20 = vsel %vm42_vm1, %v41_v13, %v39_v12  ;;  %v45_v21 = vsel %vm42_vm1, %v40_v17, %v38_v16  ;;  %p148_p12 = pnand %p147_p11, %p141_p8 }
  0x1c   :  { %51 = vrot.lane.b32.xlu1 %v44_v18, %s169_s0  ;;  %47 = vrot.lane.b32.xlu0 %v43_v19, %s169_s0 }
  0x20   :  { %53 = vrot.lane.b32.xlu1 %v46_v20, %s169_s0  ;;  %49 = vrot.lane.b32.xlu0 %v45_v21, %s169_s0 }
  0x24   :  { %77 = vrot.lane.b32.xlu1 %v34_v14, %s169_s0  ;;  %75 = vrot.lane.b32.xlu0 %v36_v15, %s169_s0 }
  0x8e   :  { %v52_v23 = vpop.permute.xlu1 %51  ;;  %v48_v24 = vpop.permute.xlu0 %47 }
  0x8f   :  { %v60_v25 = vsel %vm57_vm2, %v52_v23, %v48_v24  ;;  %v58_v28 = vsel %vm57_vm2, %v48_v24, %v52_v23 }
  0x90   :  { %62 = vrot.lane.b32.xlu0 %v60_v25, %s170_s20 }
  0x92   :  { %v54_v26 = vpop.permute.xlu1 %53  ;;  %v50_v27 = vpop.permute.xlu0 %49 }
  0x93   :  { %v61_v29 = vsel %vm57_vm2, %v54_v26, %v50_v27  ;;  %v59_v30 = vsel %vm57_vm2, %v50_v27, %v54_v26 }
  0x94   :  { %66 = vrot.lane.b32.xlu0 %v58_v28, %s170_s20  ;;  %64 = vrot.lane.b32.xlu1 %v61_v29, %s170_s20 }
  0x96   :  { %v76_v31 = vpop.permute.xlu0 %75  ;;  %v78_v32 = vpop.permute.xlu1 %77 }
  0x98   :  { %79 = vrot.lane.b32.xlu0 %v37_v11, %s169_s0  ;;  %68 = vrot.lane.b32.xlu1 %v59_v30, %s170_s20 }
  0x9c   :  { %81 = vrot.lane.b32.xlu1 %v35_v10, %s169_s0 }
 0x102   :  { %v63_v33 = vpop.permute.xlu0 %62 }
 0x106   :  { %v65_v34 = vpop.permute.xlu1 %64  ;;  %v67_v35 = vpop.permute.xlu0 %66 }
 0x107   :  { %v71_v38 = vsel %vm70_vm3, %v63_v33, %v67_v35  ;;  %v73_v39 = vsel %vm70_vm3, %v67_v35, %v63_v33 }
 0x10a   :  { %v69_v36 = vpop.permute.xlu1 %68  ;;  %v80_v37 = vpop.permute.xlu0 %79 }
 0x10b   :  { %v83_v40 = vsel %vm57_vm2, %v76_v31, %v80_v37  ;;  %v85_v41 = vsel %vm57_vm2, %v80_v37, %v76_v31  ;;  %v72_v45 = vsel %vm70_vm3, %v65_v34, %v69_v36  ;;  %v74_v46 = vsel %vm70_vm3, %v69_v36, %v65_v34 }
 0x10c   :  { %v87_v42 = vadd.f32 %v85_v41, %v71_v38  ;;  %v88_v43 = vadd.f32 %v83_v40, %v73_v39 }
 0x10e   :  { %91 = vst [vmem:[#allocation5] sm:$0xff] %v87_v42  ;;  %92 = vst [vmem:[#allocation5 + $0x8] sm:$0xff] %v88_v43  ;;  %v82_v44 = vpop.permute.xlu1 %81 }
 0x10f   :  { %v84_v47 = vsel %vm57_vm2, %v78_v32, %v82_v44  ;;  %v86_v48 = vsel %vm57_vm2, %v82_v44, %v78_v32 }
 0x110   :  { %v89_v49 = vadd.f32 %v86_v48, %v72_v45  ;;  %v90_v50 = vadd.f32 %v84_v47, %v74_v46 }
 0x112   :  { %93 = vst [vmem:[#allocation5 + $0x10] sm:$0xff] %v89_v49  ;;  %94 = vst [vmem:[#allocation5 + $0x18] sm:$0xff] %v90_v50 }
 0x113   :  { %151 = shalt.err (!%p148_p12)
}
 0x114   :  { %s152_s26 = scalar_lea.hbm %s221_s1, 512 }
 0x115   :  { %p153_p13 = scmp.ne.s32.totalorder %s221_s1, %s152_s26  ;;  %p156_p0 = scmp.lt.u32.totalorder %s152_s26, %s221_s1 }
 0x117   :  { %p158_p1 = pnand %p156_p0, %p153_p13 }
 0x119   :  { %161 = shalt.err (!%p158_p1)
}
 0x11a   :  { %106 = dma.vmem_to_hbm [thread:$0]  %s101_s22, 512, %s221_s1, [#allocation4], %s167_s16, %s167_s16, %s168_s17  }
 0x11b   :  { %164 = dma.done.wait [#allocation4], 512  }
 0x11c   :  { %165 = vsyncadd [#allocation4], 4294966784 }
 0x11d   :  { %110 = vsyncpa [#allocation3], 1 }
 0x11e   :  { %111 = vsyncpa [#allocation4], 1 }

// kernel: tpu_custom_call.1
= control target key start
LH: loop header
LB: loop body
LE: loop exit
PB: predicated region body
PF: predicated region fallthrough
CT: control target
= control target key end

     0   :  { %9 = vsyncpa [#allocation3], 0  ;;  %s1491_s0 = inlined_call_operand.hbm [shape: f32[2,3,16,128], index: 0, kind: input, shape index: {}]   ;;  %s1492_s1 = inlined_call_operand.vmem [shape: f32[2,16,128], index: 1, kind: input, shape index: {}]   ;;  %s1493_s2 = inlined_call_operand.vmem [shape: f32[2,16,128], index: 2, kind: input, shape index: {}]   ;;  %s1494_s3 = inlined_call_operand.hbm [shape: s32[2,16,128], index: 3, kind: input, shape index: {}, may-alias: {3,4}]   ;;  %s1495_s4 = inlined_call_operand.hbm [shape: s32[2,16,128], index: 4, kind: output, shape index: {}, may-alias: {3,4}]  }
   0x1   :  { %11 = vsyncpa [#allocation3 + $0x1], 0 }
   0x2   :  { %12 = vsyncpa [#allocation6], 0 }
   0x3   :  { %14 = vsyncpa [#allocation6 + $0x1], 0 }
   0x4   :  { %15 = vsyncpa [#allocation4], 0 }
   0x5   :  { %17 = vsyncpa [#allocation4 + $0x1], 0  ;;  %s1080_s15 = smov 0   ;;  %s1082_s16 = smov 0  }
   0x6   :  { %s1084_s17 = smov 0   ;;  %s1086_s18 = smov 0  }
   0x7 LB: > { %s1101_s19 = sadd.s32 4294967295, %s1018_s18   ;;  %s739_s20 = sadd.s32 4294967294, %s1018_s18   ;;  %s1018_s18 = sphi %s1086_s18, %s1512_s18   ;;  %s1014_s17 = sphi %s1084_s17, %s1511_s17   ;;  %s1010_s16 = sphi %s1082_s16, %s1510_s16   ;;  %s1006_s15 = sphi %s1080_s15, %s1509_s15  }
   0x8   : > { %s1105_s21 = sadd.s32 1, %s1018_s18   ;;  %s30_s22 = sadd.s32 1, %s1014_s17 }
   0x9   : > { %s27_s23 = ssub.s32 %s1018_s18, %s1105_s21  ;;  %p37_p0 = scmp.ne.s32.totalorder %s1014_s17, %s1010_s16 }
   0xa   : > { %p28_p1 = scmp.eq.s32.totalorder %s27_s23, 0  ;;  %p38_p2 = scmp.eq.s32.totalorder %s1018_s18, 0 }
   0xb   : > { %p43_p3 = scmp.ne.s32.totalorder %s1010_s16, %s1006_s15  ;;  %p44_p4 = scmp.eq.s32.totalorder %s1101_s19, 0 }
   0xc   : > { %s1117_s24 = scalar_select %p28_p1, %s1014_s17, %s30_s22  }
   0xd   : > { %p39_p5 = por %p38_p2, %p37_p0  ;;  %p1119_p6 = por %p44_p4, %p43_p3 }
   0xe   : > { %p145_p7 = scmp.eq.s32.totalorder %s1101_s19, 1  ;;  %p151_p8 = scmp.eq.s32.totalorder %s739_s20, 1 }
   0xf   : > { %s1498_s25 = scalar_select %p1119_p6, 1, 0 }
  0x10   : > { %p782_p10 = scmp.lt.s32.totalorder %s1018_s18, 2  ;;  %p1126_p11 = por %p145_p7, %p37_p0 }
  0x11   : > { %p1130_p12 = por %p151_p8, %p43_p3  ;;  %s1135_s28 = sand.u32 1, %s1014_s17  }
  0x12   : > { %s1499_s26 = scalar_select %p1126_p11, 1, 0 }
  0x13   : > { %s1500_s27 = scalar_select %p1130_p12, 1, 0 }
  0x14   : > { %s763_s29 = smul.u32 768, %s1018_s18  ;;  %p1144_p13 = pnand %p782_p10, %p39_p5 }
  0x15   : > { %s762_s30 = smul.u32 48, %s1135_s28  ;;  %s172_s11 = scalar_lea.sflag [#allocation3], %s1135_s28 }
  0x16   : > { %s1142_s7 = scalar_lea.hbm %s1491_s0, %s763_s29  ;;  %p870_p1 = pneg %p1144_p13 }
  0x17   : > { %s175_s9 = scalar_lea.vmem [#allocation2], %s762_s30  ;;  %s868_s12 = scalar_lea.hbm %s1142_s7, 768 }
  0x18   : > { %s182_s10 = sshll.u32 %s175_s9, 4  ;;  %p869_p0 = scmp.ne.s32.totalorder %s1142_s7, %s868_s12  ;;  %s1148_s10 = int_to_ptr.vmem [resolvable:$true] %s182_s10 }
  0x19   : > { %s873_s20 = scalar_lea.hbm %s1491_s0, 1536  ;;  %p874_p4 = scmp.lt.u32.totalorder %s1142_s7, %s1491_s0 }
  0x1a   : > { %p871_p2 = pnand %p870_p1, %p869_p0  ;;  %p875_p5 = scmp.lt.u32.totalorder %s873_s20, %s868_s12 }
  0x1b   : > { %p877_p8 = scmp.lt.u32.totalorder %s868_s12, %s1142_s7 }
  0x1c   : > { %p872_p3 = pneg %p871_p2  ;;  %p876_p7 = por %p875_p5, %p874_p4 }
  0x1e   : > { %p878_p10 = por %p877_p8, %p876_p7 }
  0x20   : > { %p879_p9 = pnand %p878_p10, %p872_p3 }
  0x22   : > { %882 = shalt.err (!%p879_p9)
}
  0x23   : > { %s883_s29 = scalar_lea.vmem %s1148_s10, 768  ;;  %s1040_s30 = smov [#allocation2]  }
  0x24   : > { %p884_p0 = scmp.ne.s32.totalorder %s1148_s10, %s883_s29  ;;  %s888_s5 = sshll.u32 %s1040_s30, 4  ;;  %s889_s5 = int_to_ptr.vmem [resolvable:$false] %s888_s5 }
  0x25   : > { %s890_s6 = scalar_lea.vmem %s889_s5, 1536  ;;  %p891_p11 = scmp.lt.s32.totalorder %s1148_s10, %s889_s5 }
  0x26   : > { %p886_p2 = pnand %p884_p0, %p870_p1  ;;  %p892_p4 = scmp.lt.s32.totalorder %s890_s6, %s883_s29 }
  0x28   : > { %p887_p12 = pneg %p886_p2  ;;  %p893_p5 = por %p892_p4, %p891_p11 }
  0x2a   : > { %p894_p7 = pnand %p893_p5, %p887_p12 }
  0x2c   : > { %897 = shalt.err (!%p894_p7)
}
  0x2d   : > { %s1041_s9 = smov 128   ;;  %s1042_s12 = smov 8  }
  0x2e   : > { %774 = dma.hbm_to_vmem [thread:$0]  (!%p1144_p13), %s1142_s7, 768, %s1148_s10, %s172_s11, %s1041_s9, %s1041_s9, %s1042_s12  }
  0x2f   : > { %p746_p9 = scmp.ge.s32.totalorder %s1018_s18, 1  ;;  %p227_p11 = scmp.lt.s32.totalorder %s1018_s18, 3 }
  0x30   : > { %s743_s13 = sshll.u32 %s1135_s28, 4  ;;  %s758_s20 = sshll.u32 %s1018_s18, 8 }
  0x31   : > { %p1184_p12 = pnand %p746_p9, %p227_p11  ;;  %s212_s22 = scalar_lea.vmem [#allocation5], %s743_s13 }
  0x32   : > { %s219_s23 = sshll.u32 %s212_s22, 4  ;;  %s1192_s5 = scalar_lea.hbm %s1494_s3, %s758_s20  ;;  %s1194_s23 = int_to_ptr.vmem [resolvable:$true] %s219_s23 }
  0x33   : > { %s209_s7 = scalar_lea.sflag [#allocation6], %s1135_s28  ;;  %s898_s10 = scalar_lea.hbm %s1192_s5, 256 }
  0x34   : > { %p899_p3 = scmp.ne.s32.totalorder %s1192_s5, %s898_s10  ;;  %s903_s13 = scalar_lea.hbm %s1494_s3, 512 }
  0x35   : > { %p904_p0 = scmp.lt.u32.totalorder %s1192_s5, %s1494_s3  ;;  %p905_p2 = scmp.lt.u32.totalorder %s903_s13, %s898_s10 }
  0x36   : > { %p901_p8 = pnand %p899_p3, %p870_p1  ;;  %p907_p5 = scmp.lt.u32.totalorder %s898_s10, %s1192_s5 }
  0x37   : > { %p906_p4 = por %p905_p2, %p904_p0 }
  0x38   : > { %p902_p10 = pneg %p901_p8 }
  0x39   : > { %p908_p7 = por %p907_p5, %p906_p4 }
  0x3b   : > { %p909_p9 = pnand %p908_p7, %p902_p10 }
  0x3d   : > { %912 = shalt.err (!%p909_p9)
}
  0x3e   : > { %s913_s29 = scalar_lea.vmem %s1194_s23, 256  ;;  %s1043_s30 = smov [#allocation5]  }
  0x3f   : > { %p914_p11 = scmp.ne.s32.totalorder %s1194_s23, %s913_s29  ;;  %s918_s11 = sshll.u32 %s1043_s30, 4  ;;  %s919_s11 = int_to_ptr.vmem [resolvable:$false] %s918_s11 }
  0x40   : > { %s920_s6 = scalar_lea.vmem %s919_s11, 512  ;;  %p921_p6 = scmp.lt.s32.totalorder %s1194_s23, %s919_s11 }
  0x41   : > { %p916_p3 = pnand %p914_p11, %p870_p1  ;;  %p922_p0 = scmp.lt.s32.totalorder %s920_s6, %s913_s29 }
  0x43   : > { %p917_p8 = pneg %p916_p3  ;;  %p923_p2 = por %p922_p0, %p921_p6 }
  0x45   : > { %p924_p4 = pnand %p923_p2, %p917_p8 }
  0x47   : > { %927 = shalt.err (!%p924_p4)
}
  0x48   : > { %777 = dma.hbm_to_vmem [thread:$0]  (!%p1144_p13), %s1192_s5, 256, %s1194_s23, %s209_s7, %s1041_s9, %s1041_s9, %s1042_s12  }
  0x49   : > { %231 = sbr.rel (%p1184_p12) target bundleno = 633 (0x279), region = 36  ;;  %s1228_s10 = sand.u32 (!%p1184_p12), 1, %s1010_s16  }
  0x4a   : > { %s764_s13 = smul.u32 (!%p1184_p12), 48, %s1228_s10  ;;  %s234_s22 = scalar_lea.sflag (!%p1184_p12), [#allocation3], %s1228_s10 }
  0x4b   : > { %p1503_p6 = scmp.ne.s32.totalorder (!%p1184_p12), %s1498_s25, 0 }
  0x4c   : > { %s237_s8 = scalar_lea.vmem (!%p1184_p12), [#allocation2], %s764_s13 }
  0x50   : > { %993 = dma.done.wait (%p1503_p6), %s234_s22, 768  }
  0x51   : > { %995 = vsyncadd (%p1503_p6), %s234_s22, 4294966528  ;;  %s747_s28 = sshll.u32 %s1228_s10, 4  ;;  %s243_s9 = scalar_lea.sflag [#allocation6], %s1228_s10 }
  0x52   : > { %s246_s12 = scalar_lea.vmem [#allocation5], %s747_s28 }
  0x53   : > { %997 = dma.done.wait (%p1503_p6), %s243_s9, 256  }
  0x54   : > { %999 = vsyncadd (%p1503_p6), %s243_s9, 4294967040  ;;  %v1244_v0 = vld [vmem:[%s246_s12] sm:$0xff]   ;;  %v1246_v1 = vld [vmem:[%s246_s12 + $0x8] sm:$0xff]   ;;  %s1044_s14 = smov 127   ;;  %s1045_s23 = smov 15   ;;  %vm316_vm0 = vcmask 1046528   ;;  %v296_v60 = vlaneseq }
  0x55   : > { %v1248_v2 = vld [vmem:[%s237_s8] sm:$0xff]  ;;  %v1255_v4 = vld [vmem:[%s237_s8 + $0x8] sm:$0xff]  ;;  %v1257_v5 = vld [vmem:[%s237_s8 + $0x18] sm:$0xff]  ;;  %p286_p13 = scmp.lt.s32.totalorder %s1101_s19, 1  ;;  %vm424_vm1 = vcmask 1040384   ;;  %s1046_s13 = smov 113  }
  0x56   : > { %336 = vrot.lane.b32.xlu1 %v1248_v2, %s1044_s14  ;;  %v317_v3 = vrot.slane %v1248_v2, 1  ;;  %330 = vrot.lane.b32.xlu0 %v1248_v2, %s1045_s23  ;;  %v318_v6 = vrot.slane %v1255_v4, 1  ;;  %v353_v7 = vrot.slane %v1257_v5, 1  ;;  %v1261_v8 = vld [vmem:[%s237_s8 + $0x10] sm:$0xff]  ;;  %v1263_v9 = vld [vmem:[%s237_s8 + $0x28] sm:$0xff]  ;;  %v1332_v63 = vand.u32 127, %v296_v60 }
  0x57   : > { %v1265_v10 = vld [vmem:[%s237_s8 + $0x20] sm:$0xff]  ;;  %v352_v11 = vrot.slane %v1261_v8, 1  ;;  %v388_v12 = vrot.slane %v1263_v9, 1  ;;  %s287_s25 = scalar_select %p286_p13, %s1101_s19, 1 }
  0x58   : > { %v387_v13 = vrot.slane %v1265_v10, 1  ;;  %v319_v14 = vsel %vm316_vm0, %v317_v3, %v318_v6  ;;  %v323_v15 = vsel %vm316_vm0, %v318_v6, %v317_v3  ;;  %vm299_vm2 = vcmp.eq.s32.totalorder %v1332_v63, 15  ;;  %s1047_s22 = smov 1   ;;  %s1372_s8 = scalar_lea.vmem [#allocation7], %s747_s28 }
  0x59   : > { %v325_v16 = vsub.f32 %v1255_v4, %v323_v15  ;;  %v354_v17 = vsel %vm316_vm0, %v352_v11, %v353_v7  ;;  %v358_v18 = vsel %vm316_vm0, %v353_v7, %v352_v11  ;;  %v324_v21 = vsub.f32 %v1248_v2, %v319_v14  ;;  %s759_s5 = sshll.u32 %s287_s25, 4  ;;  %s1386_s9 = smov 0  }
  0x5a   : > { %338 = vrot.lane.b32.xlu1 %v1255_v4, %s1044_s14  ;;  %332 = vrot.lane.b32.xlu0 %v1255_v4, %s1045_s23  ;;  %v359_v19 = vsub.f32 %v1261_v8, %v354_v17  ;;  %v360_v20 = vsub.f32 %v1257_v5, %v358_v18  ;;  %v389_v22 = vsel %vm316_vm0, %v387_v13, %v388_v12  ;;  %s290_s29 = scalar_lea.vmem %s1492_s1, %s759_s5  ;;  %s295_s6 = scalar_lea.vmem %s1493_s2, %s759_s5  ;;  %vm298_vm3 = vcmp.eq.s32.totalorder %v1332_v63, 0 }
  0x5b   : > { %v327_v23 = vand.u32 2147483647, %v325_v16  ;;  %v393_v24 = vsel %vm316_vm0, %v388_v12, %v387_v13  ;;  %v394_v25 = vsub.f32 %v1265_v10, %v389_v22  ;;  %v326_v28 = vand.u32 2147483647, %v324_v21  ;;  %v301_v34 = vld [vmem:[%s290_s29 + $0x8] sm:$0xff]  ;;  %v300_v35 = vld [vmem:[%s290_s29] sm:$0xff] }
  0x5c   : > { %v361_v26 = vand.u32 2147483647, %v359_v19  ;;  %v362_v27 = vand.u32 2147483647, %v360_v20  ;;  %v395_v29 = vsub.f32 %v1263_v9, %v393_v24  ;;  %v303_v38 = vmul.f32 %v301_v34, %v301_v34  ;;  %v1302_v40 = vld [vmem:[%s295_s6] sm:$0xff]   ;;  %v1304_v41 = vld [vmem:[%s295_s6 + $0x8] sm:$0xff]  }
  0x5d   : > { %v396_v30 = vand.u32 2147483647, %v394_v25  ;;  %v302_v39 = vmul.f32 %v300_v35, %v300_v35 }
  0x5e   : > { %367 = vrot.lane.b32.xlu1 %v1257_v5, %s1045_s23  ;;  %365 = vrot.lane.b32.xlu0 %v1261_v8, %s1045_s23  ;;  %v363_v31 = vadd.f32 %v361_v26, %v326_v28  ;;  %v364_v32 = vadd.f32 %v362_v27, %v327_v23  ;;  %v397_v33 = vand.u32 2147483647, %v395_v29  ;;  %v305_v46 = vmul.f32 %v303_v38, %v303_v38 }
  0x5f   : > { %v304_v47 = vmul.f32 %v302_v39, %v302_v39 }
  0x60   : > { %v398_v36 = vadd.f32 %v396_v30, %v363_v31  ;;  %v399_v37 = vadd.f32 %v397_v33, %v364_v32  ;;  %v1312_v52 = vmul.f32 10.0, %v305_v46 }
  0x61   : > { %v1314_v53 = vmul.f32 10.0, %v304_v47 }
  0x62   : > { %373 = vrot.lane.b32.xlu1 %v1257_v5, %s1044_s14  ;;  %371 = vrot.lane.b32.xlu0 %v1261_v8, %s1044_s14  ;;  %v421_v42 = vrot.slane %v399_v37, 7  ;;  %v425_v43 = vrot.slane %v398_v36, 7  ;;  %v446_v44 = vmul.f32 10.0, %v398_v36  ;;  %v447_v45 = vmul.f32 10.0, %v399_v37 }
  0x64   : > { %v426_v48 = vsel %vm424_vm1, %v425_v43, %v421_v42  ;;  %v429_v49 = vsel %vm424_vm1, %v421_v42, %v425_v43  ;;  %v1317_v54 = vadd.f32 %v447_v45, %v1312_v52  ;;  %v1323_v56 = vadd.f32 %v446_v44, %v1314_v53 }
  0x65   : > { %v450_v50 = vmul.f32 10.0, %v429_v49  ;;  %v451_v51 = vmul.f32 10.0, %v426_v48 }
  0x66   : > { %402 = vrot.lane.b32.xlu1 %v1263_v9, %s1045_s23  ;;  %400 = vrot.lane.b32.xlu0 %v1265_v10, %s1045_s23 }
  0x67   : > { %v1320_v55 = vadd.f32 %v451_v51, %v1312_v52  ;;  %v1326_v57 = vadd.f32 %v450_v50, %v1314_v53 }
  0x6a   : > { %408 = vrot.lane.b32.xlu1 %v1263_v9, %s1044_s14  ;;  %406 = vrot.lane.b32.xlu0 %v1265_v10, %s1044_s14 }
  0xc8   : > { %v337_v58 = vpop.permute.xlu1 %336  ;;  %v331_v59 = vpop.permute.xlu0 %330 }
  0xc9   : > { %v342_v14 = vsel %vm299_vm2, %v331_v59, %v337_v58 }
  0xca   : > { %v344_v20 = vsub.f32 %v1248_v2, %v342_v14 }
  0xcc   : > { %v339_v61 = vpop.permute.xlu1 %338  ;;  %v333_v62 = vpop.permute.xlu0 %332  ;;  %v346_v28 = vand.u32 2147483647, %v344_v20 }
  0xcd   : > { %v343_v15 = vsel %vm299_vm2, %v333_v62, %v339_v61 }
  0xce   : > { %v345_v21 = vsub.f32 %v1255_v4, %v343_v15 }
  0xd0   : > { %v368_v3 = vpop.permute.xlu1 %367  ;;  %v366_v6 = vpop.permute.xlu0 %365 }
  0xd4   : > { %v374_v7 = vpop.permute.xlu1 %373  ;;  %v372_v11 = vpop.permute.xlu0 %371 }
  0xd5   : > { %v378_v12 = vsel %vm299_vm2, %v368_v3, %v374_v7  ;;  %v377_v13 = vsel %vm299_vm2, %v366_v6, %v372_v11 }
  0xd6   : > { %v380_v16 = vsub.f32 %v1257_v5, %v378_v12  ;;  %v379_v17 = vsub.f32 %v1261_v8, %v377_v13  ;;  %v347_v5 = vand.u32 2147483647, %v345_v21 }
  0xd8   : > { %v403_v18 = vpop.permute.xlu1 %402  ;;  %v401_v19 = vpop.permute.xlu0 %400  ;;  %v382_v22 = vand.u32 2147483647, %v380_v16  ;;  %v381_v23 = vand.u32 2147483647, %v379_v17 }
  0xda   : > { %v384_v30 = vadd.f32 %v382_v22, %v347_v5  ;;  %v383_v2 = vadd.f32 %v381_v23, %v346_v28 }
  0xdc   : > { %v409_v24 = vpop.permute.xlu1 %408  ;;  %v407_v25 = vpop.permute.xlu0 %406 }
  0xdd   : > { %v413_v26 = vsel %vm299_vm2, %v403_v18, %v409_v24  ;;  %v412_v27 = vsel %vm299_vm2, %v401_v19, %v407_v25 }
  0xde   : > { %v415_v8 = vsub.f32 %v1263_v9, %v413_v26  ;;  %v414_v29 = vsub.f32 %v1265_v10, %v412_v27 }
  0xe0   : > { %v417_v31 = vand.u32 2147483647, %v415_v8  ;;  %v416_v4 = vand.u32 2147483647, %v414_v29 }
  0xe2   : > { %v419_v32 = vadd.f32 %v417_v31, %v384_v30  ;;  %v418_v33 = vadd.f32 %v416_v4, %v383_v2 }
  0xe4   : > { %434 = vrot.lane.b32.xlu1 %v419_v32, %s1046_s13  ;;  %v455_v34 = vmul.f32 10.0, %v419_v32  ;;  %432 = vrot.lane.b32.xlu0 %v418_v33, %s1046_s13  ;;  %v454_v35 = vmul.f32 10.0, %v418_v33 }
  0xe6   : > { %v1354_v36 = vadd.f32 %v455_v34, %v1312_v52  ;;  %v1357_v37 = vadd.f32 %v454_v35, %v1314_v53 }
  0xe8   : > { %440 = vrot.lane.b32.xlu1 %v419_v32, %s1047_s22  ;;  %438 = vrot.lane.b32.xlu0 %v418_v33, %s1047_s22 }
 0x156   : > { %v435_v9 = vpop.permute.xlu1 %434  ;;  %v433_v10 = vpop.permute.xlu0 %432 }
 0x15a   : > { %v441_v38 = vpop.permute.xlu1 %440  ;;  %v439_v39 = vpop.permute.xlu0 %438 }
 0x15b   : > { %v445_v42 = vsel %vm298_vm3, %v435_v9, %v441_v38  ;;  %v444_v43 = vsel %vm298_vm3, %v433_v10, %v439_v39 }
 0x15c   : > { %v459_v44 = vmul.f32 10.0, %v445_v42  ;;  %v458_v45 = vmul.f32 10.0, %v444_v43 }
 0x15e   : > { %v1365_v46 = vadd.f32 %v459_v44, %v1312_v52  ;;  %v1368_v47 = vadd.f32 %v458_v45, %v1314_v53 }
 0x15f LB: >> { %v478_v48 = vrot.slane %v1034_v40, 1  ;;  %v479_v49 = vrot.slane %v1030_v41, 1  ;;  %v485_v52 = vrot.slane %v1026_v0, 1  ;;  %v486_v53 = vrot.slane %v1022_v1, 1  ;;  %s1048_s28 = smov 127   ;;  %s1049_s12 = smov 15   ;;  %s1038_s9 = sphi %s1386_s9, %s471_s9   ;;  %v1034_v40 = vphi %v1302_v40, %v582_v40   ;;  %v1030_v41 = vphi %v1304_v41, %v583_v41   ;;  %v1026_v0 = vphi %v1244_v0, %v1505_v0   ;;  %v1022_v1 = vphi %v1246_v1, %v1504_v1  }
 0x160   : >> { %s1050_s14 = smov 113   ;;  %s1051_s23 = smov 1  }
 0x161   : >> { %v480_v50 = vsel %vm316_vm0, %v478_v48, %v479_v49  ;;  %v484_v51 = vsel %vm316_vm0, %v479_v49, %v478_v48  ;;  %v487_v62 = vsel %vm316_vm0, %v485_v52, %v486_v53  ;;  %v488_v3 = vsel %vm316_vm0, %v486_v53, %v485_v52  ;;  %s471_s9 = sadd.s32 1, %s1038_s9  }
 0x162   : >> { %v489_v58 = vadd.f32 %v480_v50, %v1323_v56  ;;  %v490_v59 = vadd.f32 %v484_v51, %v1317_v54  ;;  %p468_p1 = scmp.ge.s32.totalorder %s471_s9, 50  }
 0x163   : > { %s761_s25 = sshll.u32 (%p468_p1), %s1101_s19, 8  ;;  %s602_s29 = sshll.u32 (%p468_p1), %s1372_s8, 4  ;;  %s1447_s29 = int_to_ptr.vmem [resolvable:$true] %s602_s29 }
 0x164   : >> { %v493_v60 = vmin.f32 %v489_v58, %v1034_v40  ;;  %v494_v61 = vmin.f32 %v490_v59, %v1030_v41  ;;  %vm491_vm4 = vcmp.lt.f32.partialorder %v489_v58, %v1034_v40  ;;  %vm492_vm5 = vcmp.lt.f32.partialorder %v490_v59, %v1030_v41  ;;  %s1444_s20 = scalar_lea.hbm (%p468_p1), %s1495_s4, %s761_s25  ;;  %s589_s30 = scalar_lea.sflag (%p468_p1), [#allocation4], %s1228_s10 }
 0x165   : >> { %v495_v13 = vsel %vm491_vm4, %v487_v62, %v1026_v0  ;;  %v496_v14 = vsel %vm492_vm5, %v488_v3, %v1022_v1  ;;  %s928_s11 = scalar_lea.vmem (%p468_p1), %s1447_s29, 256  ;;  %p1506_p10 = scmp.ne.s32.totalorder (%p468_p1), %s1499_s26, 0 }
 0x166   : >> { %v498_v6 = vrot.slane %v494_v61, 7  ;;  %v501_v7 = vrot.slane %v493_v60, 7  ;;  %v506_v18 = vrot.slane %v496_v14, 7  ;;  %v507_v19 = vrot.slane %v495_v13, 7  ;;  %p929_p12 = scmp.ne.s32.totalorder (%p468_p1), %s1447_s29, %s928_s11  ;;  %s1052_s6 = smov (%p468_p1), [#allocation7]  }
 0x167   : > { %s932_s13 = sshll.u32 (%p468_p1), %s1052_s6, 4  ;;  %s933_s13 = int_to_ptr.vmem [resolvable:$false] %s932_s13 }
 0x168   : >> { %v505_v11 = vsel %vm424_vm1, %v498_v6, %v501_v7  ;;  %v502_v12 = vsel %vm424_vm1, %v501_v7, %v498_v6  ;;  %v509_v41 = vsel %vm424_vm1, %v506_v18, %v507_v19  ;;  %v508_v20 = vsel %vm424_vm1, %v507_v19, %v506_v18  ;;  %p930_p5 = pnand (%p468_p1), %p929_p12, %p1506_p10  ;;  %s934_s19 = scalar_lea.vmem (%p468_p1), %s933_s13, 512 }
 0x169   : >> { %v510_v15 = vadd.f32 %v505_v11, %v1326_v57  ;;  %v511_v16 = vadd.f32 %v502_v12, %v1320_v55  ;;  %p935_p9 = scmp.lt.s32.totalorder (%p468_p1), %s1447_s29, %s933_s13  ;;  %p936_p11 = scmp.lt.s32.totalorder (%p468_p1), %s934_s19, %s928_s11 }
 0x16a   : > { %p931_p7 = pneg (%p468_p1), %p930_p5 }
 0x16b   : >> { %v514_v17 = vmin.f32 %v510_v15, %v493_v60  ;;  %v515_v40 = vmin.f32 %v511_v16, %v494_v61  ;;  %vm512_vm6 = vcmp.lt.f32.partialorder %v510_v15, %v493_v60  ;;  %vm513_vm7 = vcmp.lt.f32.partialorder %v511_v16, %v494_v61  ;;  %p937_p3 = por (%p468_p1), %p936_p11, %p935_p9 }
 0x16c   : >> { %v516_v0 = vsel %vm512_vm6, %v509_v41, %v495_v13  ;;  %v517_v1 = vsel %vm513_vm7, %v508_v20, %v496_v14 }
 0x16d   : >> { %526 = vrot.lane.b32.xlu1 %v514_v17, %s1048_s28  ;;  %520 = vrot.lane.b32.xlu0 %v514_v17, %s1049_s12  ;;  %p938_p8 = pnand (%p468_p1), %p937_p3, %p931_p7 }
 0x171   : >> { %528 = vrot.lane.b32.xlu1 %v515_v40, %s1048_s28  ;;  %522 = vrot.lane.b32.xlu0 %v515_v40, %s1049_s12 }
 0x175   : >> { %534 = vrot.lane.b32.xlu0 %v516_v0, %s1049_s12  ;;  %536 = vrot.lane.b32.xlu1 %v517_v1, %s1049_s12 }
 0x179   : >> { %538 = vrot.lane.b32.xlu0 %v516_v0, %s1048_s28  ;;  %540 = vrot.lane.b32.xlu1 %v517_v1, %s1048_s28 }
 0x1df   : >> { %v527_v21 = vpop.permute.xlu1 %526  ;;  %v521_v22 = vpop.permute.xlu0 %520 }
 0x1e0   : >> { %v532_v23 = vsel %vm299_vm2, %v521_v22, %v527_v21 }
 0x1e1   : >> { %v544_v24 = vadd.f32 %v532_v23, %v1357_v37 }
 0x1e3   : >> { %v548_v25 = vmin.f32 %v544_v24, %v514_v17  ;;  %v529_v26 = vpop.permute.xlu1 %528  ;;  %v523_v27 = vpop.permute.xlu0 %522  ;;  %vm546_vm8 = vcmp.lt.f32.partialorder %v544_v24, %v514_v17 }
 0x1e4   : >> { %v533_v28 = vsel %vm299_vm2, %v523_v27, %v529_v26 }
 0x1e5   : >> { %v545_v5 = vadd.f32 %v533_v28, %v1354_v36  ;;  %554 = vrot.lane.b32.xlu0 %v548_v25, %s1050_s14 }
 0x1e7   : >> { %v549_v8 = vmin.f32 %v545_v5, %v515_v40  ;;  %v535_v29 = vpop.permute.xlu0 %534  ;;  %v537_v30 = vpop.permute.xlu1 %536  ;;  %vm547_vm9 = vcmp.lt.f32.partialorder %v545_v5, %v515_v40 }
 0x1e9   : >> { %560 = vrot.lane.b32.xlu0 %v548_v25, %s1051_s23  ;;  %556 = vrot.lane.b32.xlu1 %v549_v8, %s1050_s14 }
 0x1eb   : >> { %v539_v2 = vpop.permute.xlu0 %538  ;;  %v541_v31 = vpop.permute.xlu1 %540 }
 0x1ec   : >> { %v542_v4 = vsel %vm299_vm2, %v535_v29, %v539_v2  ;;  %v543_v32 = vsel %vm299_vm2, %v537_v30, %v541_v31 }
 0x1ed   : >> { %562 = vrot.lane.b32.xlu1 %v549_v8, %s1051_s23  ;;  %v550_v33 = vsel %vm546_vm8, %v542_v4, %v516_v0  ;;  %v551_v34 = vsel %vm547_vm9, %v543_v32, %v517_v1 }
 0x1ee   : >> { %568 = vrot.lane.b32.xlu0 %v550_v33, %s1050_s14 }
 0x1f1   : >> { %570 = vrot.lane.b32.xlu1 %v551_v34, %s1050_s14 }
 0x1f2   : >> { %572 = vrot.lane.b32.xlu0 %v550_v33, %s1051_s23 }
 0x1f5   : >> { %574 = vrot.lane.b32.xlu1 %v551_v34, %s1051_s23 }
 0x257   : >> { %v555_v35 = vpop.permute.xlu0 %554 }
 0x25b   : >> { %v561_v9 = vpop.permute.xlu0 %560  ;;  %v557_v10 = vpop.permute.xlu1 %556 }
 0x25c   : >> { %v566_v38 = vsel %vm298_vm3, %v555_v35, %v561_v9 }
 0x25d   : >> { %v578_v39 = vadd.f32 %v566_v38, %v1368_v47 }
 0x25f   : >> { %v582_v40 = vmin.f32 %v578_v39, %v548_v25   ;;  %v563_v42 = vpop.permute.xlu1 %562  ;;  %vm580_vm10 = vcmp.lt.f32.partialorder %v578_v39, %v548_v25 }
 0x260   : >> { %v567_v43 = vsel %vm298_vm3, %v557_v10, %v563_v42  ;;  %v569_v44 = vpop.permute.xlu0 %568 }
 0x261   : >> { %v579_v45 = vadd.f32 %v567_v43, %v1365_v46 }
 0x263   : >> { %v583_v41 = vmin.f32 %v579_v45, %v549_v8   ;;  %v571_v48 = vpop.permute.xlu1 %570  ;;  %vm581_vm11 = vcmp.lt.f32.partialorder %v579_v45, %v549_v8 }
 0x264   : >> { %v573_v49 = vpop.permute.xlu0 %572  ;;  %470 = sbr.rel (!%p468_p1) target bundleno = 351 (0x15f), region = 107 }
 0x265   : >> { %v576_v50 = vsel %vm298_vm3, %v569_v44, %v573_v49 }
 0x266   : >> { %v584_v51 = vsel %vm580_vm10, %v576_v50, %v550_v33  }
 0x267   : >> { %v575_v52 = vpop.permute.xlu1 %574  ;;  %v1505_v0 = vmov %v584_v51  ;;  %586 = vst [vmem:[%s1372_s8] sm:$0xff] (%p468_p1), %v584_v51 }
 0x268   : >> { %v577_v53 = vsel %vm298_vm3, %v571_v48, %v575_v52 }
 0x269   : >> { %v585_v58 = vsel %vm581_vm11, %v577_v53, %v551_v34  }
 0x26a   : >> { %v1504_v1 = vmov %v585_v58  ;;  %587 = vst [vmem:[%s1372_s8 + $0x8] sm:$0xff] (%p468_p1), %v585_v58 }
 0x26b   : > { %941 = shalt.err (!%p938_p8)
}
 0x26c   : > { %s942_s22 = scalar_lea.hbm %s1444_s20, 256  ;;  %s946_s28 = scalar_lea.hbm %s1495_s4, 512 }
 0x26d   : > { %p943_p0 = scmp.ne.s32.totalorder %s1444_s20, %s942_s22  ;;  %p947_p6 = scmp.lt.u32.totalorder %s1444_s20, %s1495_s4 }
 0x26e   : > { %p948_p13 = scmp.lt.u32.totalorder %s946_s28, %s942_s22  ;;  %p950_p12 = scmp.lt.u32.totalorder %s942_s22, %s1444_s20 }
 0x26f   : > { %p944_p2 = pnand %p943_p0, %p1506_p10 }
 0x270   : > { %p949_p1 = por %p948_p13, %p947_p6 }
 0x271   : > { %p945_p4 = pneg %p944_p2 }
 0x272   : > { %p951_p5 = por %p950_p12, %p949_p1 }
 0x274   : > { %p952_p7 = pnand %p951_p5, %p945_p4 }
 0x276   : > { %955 = shalt.err (!%p952_p7)
}
 0x277   : > { %s1053_s23 = smov 128   ;;  %s1054_s25 = smov 8  }
 0x278   : > { %769 = dma.vmem_to_hbm [thread:$0]  (%p1506_p10), %s1447_s29, 256, %s1444_s20, %s589_s30, %s1053_s23, %s1053_s23, %s1054_s25  }
 0x279 PF: > { %s617_s5 = sand.u32 1, %s1006_s15   ;;  %p1507_p9 = scmp.ne.s32.totalorder %s1500_s27, 0 }
 0x27a   : > { %p1508_p11 = scmp.ge.s32.totalorder %s1018_s18, 2  ;;  %s618_s7 = scalar_lea.sflag [#allocation4], %s617_s5 }
 0x27c   : > { %p779_p3 = pnand %p1508_p11, %p1507_p9 }
 0x27e   : > { %1001 = dma.done.wait (!%p779_p3), %s618_s7, 256  }
 0x27f   : > { %1003 = vsyncadd (!%p779_p3), %s618_s7, 4294967040  ;;  %p20_p8 = scmp.ge.s32.totalorder %s1105_s21, 4   ;;  %s1509_s15 = smov %s1010_s16 }
 0x280   : > { %s1510_s16 = smov %s1014_s17  ;;  %s1511_s17 = smov %s1117_s24 }
 0x281   : > { %s1512_s18 = smov %s1105_s21  ;;  %22 = sbr.rel (!%p20_p8) target bundleno = 7 (0x7), region = 118 }
 0x288   :  { %623 = vsyncpa [#allocation3], 1 }
 0x289   :  { %625 = vsyncpa [#allocation3 + $0x1], 1 }
 0x28a   :  { %626 = vsyncpa [#allocation6], 1 }
 0x28b   :  { %628 = vsyncpa [#allocation6 + $0x1], 1 }
 0x28c   :  { %629 = vsyncpa [#allocation4], 1 }
 0x28d   :  { %631 = vsyncpa [#allocation4 + $0x1], 1 }

</bundles_post_ra>
